<compile_context>
chip_gen: v5e
topology: v5e:2x2
jax: 0.10.0
libtpu: 0.0.40
codegen_flags: <defaults>
</compile_context>

<pallas_src>
import functools

import jax
import jax.numpy as jnp
from jax import lax
from jax.experimental import pallas as pl
from jax.experimental.pallas import tpu as pltpu


def _fused_attention_kernel(x_ref, qkv_w_ref, qkv_b_ref, proj_w_ref, proj_b_ref,
                            o_ref, *, num_heads, scale):
    x = x_ref[...]                                # (N, C), native dtype
    dt = x.dtype
    N, C = x.shape
    hd = C // num_heads

    # ---- qkv projection: native-dtype MXU operands, f32 accumulation. -------
    qkv = jnp.dot(x, qkv_w_ref[...], preferred_element_type=jnp.float32)
    qkv = (qkv + qkv_b_ref[...].astype(jnp.float32)).astype(dt)      # (N, 3C)

    # ---- per-head scaled-dot-product attention (full softmax over N). -------
    # The head loop is statically unrolled; each head is a static lane slice of
    # the VMEM-resident qkv tile.
    # TODO(synk): for very large N (>~2k) on v7x (64 MiB VMEM) this should
    # become a flash-style online-softmax loop over KV tiles; full softmax is
    # fine for ViT-sized token counts.
    head_outs = []
    for h in range(num_heads):
        # Fold the softmax scale into q (cheaper than scaling the NxN scores).
        q = qkv[:, h * hd:(h + 1) * hd] * scale              # (N, hd), dt
        k = qkv[:, C + h * hd:C + (h + 1) * hd]              # (N, hd)
        v = qkv[:, 2 * C + h * hd:2 * C + (h + 1) * hd]      # (N, hd)
        # Contract head dims directly -> (N, N); no materialized transpose.
        s = lax.dot_general(q, k, (((1,), (1,)), ((), ())),
                            preferred_element_type=jnp.float32)
        s = s - jnp.max(s, axis=-1, keepdims=True)
        p = jnp.exp(s)
        p = p * pl.reciprocal(jnp.sum(p, axis=-1, keepdims=True), approx=True)
        head_outs.append(jnp.dot(p.astype(dt), v,
                                 preferred_element_type=jnp.float32).astype(dt))
    o = jnp.concatenate(head_outs, axis=-1)                            # (N, C)

    # ---- output projection (single wide-K matmul keeps MXU well fed). -------
    out = jnp.dot(o, proj_w_ref[...], preferred_element_type=jnp.float32)
    o_ref[...] = (out + proj_b_ref[...].astype(jnp.float32)).astype(o_ref.dtype)


def vit_attention_forward(x, params, num_heads):
    """Equivalent of Attention.forward for channels-last x of shape (B,H,W,C)."""
    B, H, W, C = x.shape
    N = H * W
    assert C % num_heads == 0
    hd = C // num_heads
    scale = float(hd) ** -0.5

    xt = x.reshape(B, N, C)                 # contiguous collapse, no data move
    qkv_w = params["qkv_w"]                 # (C, 3C)
    qkv_b = params["qkv_b"].reshape(1, 3 * C)
    proj_w = params["proj_w"]               # (C, C)
    proj_b = params["proj_b"].reshape(1, C)

    tok_spec = pl.BlockSpec((pl.Squeezed(), N, C), lambda b: (b, 0, 0))

    cost = pl.CostEstimate(
        flops=int(B * (2 * N * C * 3 * C              # qkv proj
                       + num_heads * 4 * N * N * hd   # QK^T + PV
                       + 2 * N * C * C)),             # out proj
        transcendentals=int(B * num_heads * N * N),   # exp
        bytes_accessed=int((2 * B * N * C + 3 * C * C + 3 * C + C * C + C)
                           * x.dtype.itemsize),
    )

    out = pl.pallas_call(
        functools.partial(_fused_attention_kernel,
                          num_heads=num_heads, scale=scale),
        out_shape=jax.ShapeDtypeStruct((B, N, C), x.dtype),
        grid=(B,),
        in_specs=[
            tok_spec,
            pl.BlockSpec((C, 3 * C), lambda b: (0, 0)),   # stays VMEM-resident
            pl.BlockSpec((1, 3 * C), lambda b: (0, 0)),
            pl.BlockSpec((C, C), lambda b: (0, 0)),
            pl.BlockSpec((1, C), lambda b: (0, 0)),
        ],
        out_specs=tok_spec,
        compiler_params=pltpu.CompilerParams(
            dimension_semantics=("parallel",)),
        cost_estimate=cost,
    )(xt, qkv_w, qkv_b, proj_w, proj_b)
    return out.reshape(B, H, W, C)


# ------------------------------------------------------------------------------
# Pure-JAX reference (mirrors the PyTorch forward) for sanity checking.
# ------------------------------------------------------------------------------
def reference_forward(x, params, num_heads):
    B, H, W, C = x.shape
    N = H * W
    hd = C // num_heads
    scale = hd ** -0.5
    xt = x.reshape(B, N, C)
    qkv = xt @ params["qkv_w"] + params["qkv_b"]
    qkv = qkv.reshape(B, N, 3, num_heads, hd).transpose(2, 0, 3, 1, 4)
    q, k, v = qkv[0], qkv[1], qkv[2]
    s = jnp.einsum("bhqd,bhkd->bhqk", q, k) * scale
    p = jax.nn.softmax(s, axis=-1)
    o = jnp.einsum("bhqk,bhkd->bhqd", p, v)
    o = o.transpose(0, 2, 1, 3).reshape(B, N, C)
    out = o @ params["proj_w"] + params["proj_b"]
    return out.reshape(B, H, W, C)


if __name__ == "__main__":
    # Small shapes consistent with the module; C=128 keeps the output lane-dense.
    B, H, W, C = 2, 4, 4, 128
    num_heads = 4

    key = jax.random.PRNGKey(0)
    kx, kw1, kb1, kw2, kb2 = jax.random.split(key, 5)
    x = jax.random.normal(kx, (B, H, W, C), dtype=jnp.float32)
    params = {
        # stored as (in, out) so the kernel computes x @ W (== PyTorch x @ W.T)
        "qkv_w": jax.random.normal(kw1, (C, 3 * C), dtype=jnp.float32) * 0.03,
        # nonzero bias so the qkv bias-add path is actually exercised
        "qkv_b": jax.random.normal(kb1, (3 * C,), dtype=jnp.float32) * 0.02,
        "proj_w": jax.random.normal(kw2, (C, C), dtype=jnp.float32) * 0.03,
        "proj_b": jax.random.normal(kb2, (C,), dtype=jnp.float32) * 0.02,
    }
    # TODO(synk): attn_drop / proj_drop are 0.0 and q_norm/k_norm/rope are
    # nn.Identity in the default config, so they are intentionally omitted.

    ref = reference_forward(x, params, num_heads)

    # f32 path (tolerance covers the EUP approx-reciprocal softmax normalizer).
    out = jax.block_until_ready(vit_attention_forward(x, params, num_heads))
    assert out.shape == (B, H, W, C)
    assert jnp.allclose(out, ref, atol=3e-3, rtol=3e-3), \
        float(jnp.max(jnp.abs(out - ref)))

    # bf16 path: native bf16 MXU operands with f32 accumulation (loose check).
    xb = x.astype(jnp.bfloat16)
    pb = {k: v.astype(jnp.bfloat16) for k, v in params.items()}
    outb = jax.block_until_ready(vit_attention_forward(xb, pb, num_heads))
    assert jnp.allclose(outb.astype(jnp.float32), ref, atol=1e-1, rtol=1e-1), \
        float(jnp.max(jnp.abs(outb.astype(jnp.float32) - ref)))

    print("KERNEL_OK")
</pallas_src>

<mosaic_0001>
module attributes {stable_mosaic.version = 11 : i64} {
  func.func @_fused_attention_kernel(%arg0: i32, %arg1: memref<1x16x128xf32, #tpu.memory_space<vmem>>, %arg2: memref<128x384xf32, #tpu.memory_space<vmem>>, %arg3: memref<1x384xf32, #tpu.memory_space<vmem>>, %arg4: memref<128x128xf32, #tpu.memory_space<vmem>>, %arg5: memref<1x128xf32, #tpu.memory_space<vmem>>, %arg6: memref<1x16x128xf32, #tpu.memory_space<vmem>>) attributes {dimension_semantics = [#tpu.dimension_semantics<parallel>], iteration_bounds = array<i64: 2>, scalar_prefetch = 0 : i64, scratch_operands = 0 : i64, tpu.core_type = #tpu.core_type<tc>, window_params = [{transform_indices = @transform_0, window_bounds = array<i64: 1, 16, 128>}, {pipeline_mode = #tpu.pipeline_mode<synchronous>, transform_indices = @transform_1, window_bounds = array<i64: 128, 384>}, {pipeline_mode = #tpu.pipeline_mode<synchronous>, transform_indices = @transform_2, window_bounds = array<i64: 1, 384>}, {pipeline_mode = #tpu.pipeline_mode<synchronous>, transform_indices = @transform_3, window_bounds = array<i64: 128, 128>}, {pipeline_mode = #tpu.pipeline_mode<synchronous>, transform_indices = @transform_4, window_bounds = array<i64: 1, 128>}, {transform_indices = @transform_5, window_bounds = array<i64: 1, 16, 128>}]} {
    %c0 = arith.constant 0 : index
    %c0_0 = arith.constant 0 : index
    %c0_1 = arith.constant 0 : index
    %0 = vector.load %arg1[%c0, %c0_0, %c0_1] : memref<1x16x128xf32, #tpu.memory_space<vmem>>, vector<1x16x128xf32>
    %1 = vector.shape_cast %0 : vector<1x16x128xf32> to vector<16x128xf32>
    %c0_2 = arith.constant 0 : index
    %c0_3 = arith.constant 0 : index
    %2 = vector.load %arg2[%c0_2, %c0_3] : memref<128x384xf32, #tpu.memory_space<vmem>>, vector<128x384xf32>
    %cst = arith.constant dense<0.000000e+00> : vector<16x384xf32>
    %3 = tpu.matmul %1, %2, %cst {dimension_numbers = #tpu.dot_dimension_numbers<[1], [0], [0], [1], [0, 0, 1, 1], [], []>} : vector<16x128xf32>, vector<128x384xf32>, vector<16x384xf32> -> vector<16x384xf32>
    %c0_4 = arith.constant 0 : index
    %c0_5 = arith.constant 0 : index
    %4 = vector.load %arg3[%c0_4, %c0_5] : memref<1x384xf32, #tpu.memory_space<vmem>>, vector<1x384xf32>
    %5 = vector.broadcast %4 : vector<1x384xf32> to vector<16x384xf32>
    %6 = arith.addf %3, %5 : vector<16x384xf32>
    %7 = vector.extract_strided_slice %6 {offsets = [0, 0], sizes = [16, 32], strides = [1, 1]} : vector<16x384xf32> to vector<16x32xf32>
    %cst_6 = arith.constant 0.176776692 : f32
    %8 = vector.broadcast %cst_6 : f32 to vector<16x32xf32>
    %9 = arith.mulf %7, %8 : vector<16x32xf32>
    %10 = vector.extract_strided_slice %6 {offsets = [0, 128], sizes = [16, 32], strides = [1, 1]} : vector<16x384xf32> to vector<16x32xf32>
    %11 = vector.extract_strided_slice %6 {offsets = [0, 256], sizes = [16, 32], strides = [1, 1]} : vector<16x384xf32> to vector<16x32xf32>
    %cst_7 = arith.constant dense<0.000000e+00> : vector<16x16xf32>
    %12 = tpu.matmul %9, %10, %cst_7 {dimension_numbers = #tpu.dot_dimension_numbers<[1], [1], [0], [0], [0, 0, 1, 0], [], []>} : vector<16x32xf32>, vector<16x32xf32>, vector<16x16xf32> -> vector<16x16xf32>
    %cst_8 = arith.constant dense<0xFF800000> : vector<16xf32>
    %13 = vector.multi_reduction <maximumf>, %12, %cst_8 [1] : vector<16x16xf32> to vector<16xf32>
    %14 = vector.shape_cast %13 : vector<16xf32> to vector<16x1xf32>
    %15 = vector.broadcast %14 : vector<16x1xf32> to vector<16x16xf32>
    %16 = arith.subf %12, %15 : vector<16x16xf32>
    %17 = math.exp %16 : vector<16x16xf32>
    %cst_9 = arith.constant dense<0.000000e+00> : vector<16xf32>
    %18 = vector.multi_reduction <add>, %17, %cst_9 [1] : vector<16x16xf32> to vector<16xf32>
    %19 = vector.shape_cast %18 : vector<16xf32> to vector<16x1xf32>
    %20 = tpu.reciprocal %19 {approx = true} : vector<16x1xf32> -> vector<16x1xf32>
    %21 = vector.broadcast %20 : vector<16x1xf32> to vector<16x16xf32>
    %22 = arith.mulf %17, %21 : vector<16x16xf32>
    %cst_10 = arith.constant dense<0.000000e+00> : vector<16x32xf32>
    %23 = tpu.matmul %22, %11, %cst_10 {dimension_numbers = #tpu.dot_dimension_numbers<[1], [0], [0], [1], [0, 0, 1, 1], [], []>} : vector<16x16xf32>, vector<16x32xf32>, vector<16x32xf32> -> vector<16x32xf32>
    %24 = vector.extract_strided_slice %6 {offsets = [0, 32], sizes = [16, 32], strides = [1, 1]} : vector<16x384xf32> to vector<16x32xf32>
    %cst_11 = arith.constant 0.176776692 : f32
    %25 = vector.broadcast %cst_11 : f32 to vector<16x32xf32>
    %26 = arith.mulf %24, %25 : vector<16x32xf32>
    %27 = vector.extract_strided_slice %6 {offsets = [0, 160], sizes = [16, 32], strides = [1, 1]} : vector<16x384xf32> to vector<16x32xf32>
    %28 = vector.extract_strided_slice %6 {offsets = [0, 288], sizes = [16, 32], strides = [1, 1]} : vector<16x384xf32> to vector<16x32xf32>
    %cst_12 = arith.constant dense<0.000000e+00> : vector<16x16xf32>
    %29 = tpu.matmul %26, %27, %cst_12 {dimension_numbers = #tpu.dot_dimension_numbers<[1], [1], [0], [0], [0, 0, 1, 0], [], []>} : vector<16x32xf32>, vector<16x32xf32>, vector<16x16xf32> -> vector<16x16xf32>
    %cst_13 = arith.constant dense<0xFF800000> : vector<16xf32>
    %30 = vector.multi_reduction <maximumf>, %29, %cst_13 [1] : vector<16x16xf32> to vector<16xf32>
    %31 = vector.shape_cast %30 : vector<16xf32> to vector<16x1xf32>
    %32 = vector.broadcast %31 : vector<16x1xf32> to vector<16x16xf32>
    %33 = arith.subf %29, %32 : vector<16x16xf32>
    %34 = math.exp %33 : vector<16x16xf32>
    %cst_14 = arith.constant dense<0.000000e+00> : vector<16xf32>
    %35 = vector.multi_reduction <add>, %34, %cst_14 [1] : vector<16x16xf32> to vector<16xf32>
    %36 = vector.shape_cast %35 : vector<16xf32> to vector<16x1xf32>
    %37 = tpu.reciprocal %36 {approx = true} : vector<16x1xf32> -> vector<16x1xf32>
    %38 = vector.broadcast %37 : vector<16x1xf32> to vector<16x16xf32>
    %39 = arith.mulf %34, %38 : vector<16x16xf32>
    %cst_15 = arith.constant dense<0.000000e+00> : vector<16x32xf32>
    %40 = tpu.matmul %39, %28, %cst_15 {dimension_numbers = #tpu.dot_dimension_numbers<[1], [0], [0], [1], [0, 0, 1, 1], [], []>} : vector<16x16xf32>, vector<16x32xf32>, vector<16x32xf32> -> vector<16x32xf32>
    %41 = vector.extract_strided_slice %6 {offsets = [0, 64], sizes = [16, 32], strides = [1, 1]} : vector<16x384xf32> to vector<16x32xf32>
    %cst_16 = arith.constant 0.176776692 : f32
    %42 = vector.broadcast %cst_16 : f32 to vector<16x32xf32>
    %43 = arith.mulf %41, %42 : vector<16x32xf32>
    %44 = vector.extract_strided_slice %6 {offsets = [0, 192], sizes = [16, 32], strides = [1, 1]} : vector<16x384xf32> to vector<16x32xf32>
    %45 = vector.extract_strided_slice %6 {offsets = [0, 320], sizes = [16, 32], strides = [1, 1]} : vector<16x384xf32> to vector<16x32xf32>
    %cst_17 = arith.constant dense<0.000000e+00> : vector<16x16xf32>
    %46 = tpu.matmul %43, %44, %cst_17 {dimension_numbers = #tpu.dot_dimension_numbers<[1], [1], [0], [0], [0, 0, 1, 0], [], []>} : vector<16x32xf32>, vector<16x32xf32>, vector<16x16xf32> -> vector<16x16xf32>
    %cst_18 = arith.constant dense<0xFF800000> : vector<16xf32>
    %47 = vector.multi_reduction <maximumf>, %46, %cst_18 [1] : vector<16x16xf32> to vector<16xf32>
    %48 = vector.shape_cast %47 : vector<16xf32> to vector<16x1xf32>
    %49 = vector.broadcast %48 : vector<16x1xf32> to vector<16x16xf32>
    %50 = arith.subf %46, %49 : vector<16x16xf32>
    %51 = math.exp %50 : vector<16x16xf32>
    %cst_19 = arith.constant dense<0.000000e+00> : vector<16xf32>
    %52 = vector.multi_reduction <add>, %51, %cst_19 [1] : vector<16x16xf32> to vector<16xf32>
    %53 = vector.shape_cast %52 : vector<16xf32> to vector<16x1xf32>
    %54 = tpu.reciprocal %53 {approx = true} : vector<16x1xf32> -> vector<16x1xf32>
    %55 = vector.broadcast %54 : vector<16x1xf32> to vector<16x16xf32>
    %56 = arith.mulf %51, %55 : vector<16x16xf32>
    %cst_20 = arith.constant dense<0.000000e+00> : vector<16x32xf32>
    %57 = tpu.matmul %56, %45, %cst_20 {dimension_numbers = #tpu.dot_dimension_numbers<[1], [0], [0], [1], [0, 0, 1, 1], [], []>} : vector<16x16xf32>, vector<16x32xf32>, vector<16x32xf32> -> vector<16x32xf32>
    %58 = vector.extract_strided_slice %6 {offsets = [0, 96], sizes = [16, 32], strides = [1, 1]} : vector<16x384xf32> to vector<16x32xf32>
    %cst_21 = arith.constant 0.176776692 : f32
    %59 = vector.broadcast %cst_21 : f32 to vector<16x32xf32>
    %60 = arith.mulf %58, %59 : vector<16x32xf32>
    %61 = vector.extract_strided_slice %6 {offsets = [0, 224], sizes = [16, 32], strides = [1, 1]} : vector<16x384xf32> to vector<16x32xf32>
    %62 = vector.extract_strided_slice %6 {offsets = [0, 352], sizes = [16, 32], strides = [1, 1]} : vector<16x384xf32> to vector<16x32xf32>
    %cst_22 = arith.constant dense<0.000000e+00> : vector<16x16xf32>
    %63 = tpu.matmul %60, %61, %cst_22 {dimension_numbers = #tpu.dot_dimension_numbers<[1], [1], [0], [0], [0, 0, 1, 0], [], []>} : vector<16x32xf32>, vector<16x32xf32>, vector<16x16xf32> -> vector<16x16xf32>
    %cst_23 = arith.constant dense<0xFF800000> : vector<16xf32>
    %64 = vector.multi_reduction <maximumf>, %63, %cst_23 [1] : vector<16x16xf32> to vector<16xf32>
    %65 = vector.shape_cast %64 : vector<16xf32> to vector<16x1xf32>
    %66 = vector.broadcast %65 : vector<16x1xf32> to vector<16x16xf32>
    %67 = arith.subf %63, %66 : vector<16x16xf32>
    %68 = math.exp %67 : vector<16x16xf32>
    %cst_24 = arith.constant dense<0.000000e+00> : vector<16xf32>
    %69 = vector.multi_reduction <add>, %68, %cst_24 [1] : vector<16x16xf32> to vector<16xf32>
    %70 = vector.shape_cast %69 : vector<16xf32> to vector<16x1xf32>
    %71 = tpu.reciprocal %70 {approx = true} : vector<16x1xf32> -> vector<16x1xf32>
    %72 = vector.broadcast %71 : vector<16x1xf32> to vector<16x16xf32>
    %73 = arith.mulf %68, %72 : vector<16x16xf32>
    %cst_25 = arith.constant dense<0.000000e+00> : vector<16x32xf32>
    %74 = tpu.matmul %73, %62, %cst_25 {dimension_numbers = #tpu.dot_dimension_numbers<[1], [0], [0], [1], [0, 0, 1, 1], [], []>} : vector<16x16xf32>, vector<16x32xf32>, vector<16x32xf32> -> vector<16x32xf32>
    %75 = tpu.concatenate %23, %40, %57, %74 in 1 : vector<16x32xf32>, vector<16x32xf32>, vector<16x32xf32>, vector<16x32xf32> -> vector<16x128xf32>
    %c0_26 = arith.constant 0 : index
    %c0_27 = arith.constant 0 : index
    %76 = vector.load %arg4[%c0_26, %c0_27] : memref<128x128xf32, #tpu.memory_space<vmem>>, vector<128x128xf32>
    %cst_28 = arith.constant dense<0.000000e+00> : vector<16x128xf32>
    %77 = tpu.matmul %75, %76, %cst_28 {dimension_numbers = #tpu.dot_dimension_numbers<[1], [0], [0], [1], [0, 0, 1, 1], [], []>} : vector<16x128xf32>, vector<128x128xf32>, vector<16x128xf32> -> vector<16x128xf32>
    %c0_29 = arith.constant 0 : index
    %c0_30 = arith.constant 0 : index
    %78 = vector.load %arg5[%c0_29, %c0_30] : memref<1x128xf32, #tpu.memory_space<vmem>>, vector<1x128xf32>
    %79 = vector.broadcast %78 : vector<1x128xf32> to vector<16x128xf32>
    %80 = arith.addf %77, %79 : vector<16x128xf32>
    %c0_31 = arith.constant 0 : index
    %c0_32 = arith.constant 0 : index
    %c0_33 = arith.constant 0 : index
    %81 = vector.load %arg6[%c0_31, %c0_32, %c0_33] : memref<1x16x128xf32, #tpu.memory_space<vmem>>, vector<1x16x128xf32>
    %82 = vector.shape_cast %81 : vector<1x16x128xf32> to vector<16x128xf32>
    %83 = vector.shape_cast %80 : vector<16x128xf32> to vector<1x16x128xf32>
    tpu.vector_store %arg6[%c0_31, %c0_32, %c0_33], %83 {strides = array<i32>} : memref<1x16x128xf32, #tpu.memory_space<vmem>>, vector<1x16x128xf32>,
    return
  }
  func.func @transform_0(%arg0: i32) -> (i32, i32, i32) {
    %c0_i32 = arith.constant 0 : i32
    %c0_i32_0 = arith.constant 0 : i32
    %c0_i32_1 = arith.constant 0 : i32
    return %arg0, %c0_i32, %c0_i32_0 : i32, i32, i32
  }
  func.func @transform_1(%arg0: i32) -> (i32, i32) {
    %c0_i32 = arith.constant 0 : i32
    %c0_i32_0 = arith.constant 0 : i32
    %c0_i32_1 = arith.constant 0 : i32
    return %c0_i32, %c0_i32_0 : i32, i32
  }
  func.func @transform_2(%arg0: i32) -> (i32, i32) {
    %c0_i32 = arith.constant 0 : i32
    %c0_i32_0 = arith.constant 0 : i32
    %c0_i32_1 = arith.constant 0 : i32
    return %c0_i32, %c0_i32_0 : i32, i32
  }
  func.func @transform_3(%arg0: i32) -> (i32, i32) {
    %c0_i32 = arith.constant 0 : i32
    %c0_i32_0 = arith.constant 0 : i32
    %c0_i32_1 = arith.constant 0 : i32
    return %c0_i32, %c0_i32_0 : i32, i32
  }
  func.func @transform_4(%arg0: i32) -> (i32, i32) {
    %c0_i32 = arith.constant 0 : i32
    %c0_i32_0 = arith.constant 0 : i32
    %c0_i32_1 = arith.constant 0 : i32
    return %c0_i32, %c0_i32_0 : i32, i32
  }
  func.func @transform_5(%arg0: i32) -> (i32, i32, i32) {
    %c0_i32 = arith.constant 0 : i32
    %c0_i32_0 = arith.constant 0 : i32
    %c0_i32_1 = arith.constant 0 : i32
    return %arg0, %c0_i32, %c0_i32_0 : i32, i32, i32
  }
}

</mosaic_0001>

<bundles_post_ra>
// kernel: tpu_custom_call.1
= control target key start
LH: loop header
LB: loop body
LE: loop exit
PB: predicated region body
PF: predicated region fallthrough
CT: control target
= control target key end

     0   :  { %10 = vsyncpa [#allocation3], 0  ;;  %s1675_s0 = inlined_call_operand.hbm [shape: f32[2,16,128], index: 0, kind: input, shape index: {}]   ;;  %s1676_s1 = inlined_call_operand.hbm [shape: f32[128,384], index: 1, kind: input, shape index: {}]   ;;  %s1677_s2 = inlined_call_operand.hbm [shape: f32[1,384], index: 2, kind: input, shape index: {}]   ;;  %s1678_s3 = inlined_call_operand.hbm [shape: f32[128,128], index: 3, kind: input, shape index: {}]   ;;  %s1679_s4 = inlined_call_operand.vmem [shape: f32[1,128], index: 4, kind: input, shape index: {}]   ;;  %s1680_s5 = inlined_call_operand.hbm [shape: f32[2,16,128], index: 5, kind: output, shape index: {}]  }
   0x1   :  { %12 = vsyncpa [#allocation3 + $0x1], 0 }
   0x2   :  { %13 = vsyncpa [#allocation6], 0 }
   0x3   :  { %14 = vsyncpa [#allocation9], 0 }
   0x4   :  { %15 = vsyncpa [#allocation4], 0 }
   0x5   :  { %17 = vsyncpa [#allocation4 + $0x1], 0  ;;  %s1413_s18 = smov 0   ;;  %s1415_s19 = smov 0  }
   0x6   :  { %s1417_s20 = smov 0   ;;  %s1419_s21 = smov 0  }
   0x7 LB: > { %s1434_s22 = sadd.s32 4294967295, %s1369_s21   ;;  %s995_s23 = sadd.s32 4294967294, %s1369_s21   ;;  %s1369_s21 = sphi %s1419_s21, %s1693_s21   ;;  %s1365_s20 = sphi %s1417_s20, %s1692_s20   ;;  %s1361_s19 = sphi %s1415_s19, %s1691_s19   ;;  %s1357_s18 = sphi %s1413_s18, %s1690_s18  }
   0x8   : > { %p43_p0 = scmp.ne.s32.totalorder %s1361_s19, %s1357_s18  ;;  %p44_p1 = scmp.eq.s32.totalorder %s1434_s22, 0 }
   0x9   : > { %p151_p2 = scmp.eq.s32.totalorder %s1434_s22, 1  ;;  %p157_p3 = scmp.eq.s32.totalorder %s995_s23, 1 }
   0xa   : > { %p1443_p4 = por %p44_p1, %p43_p0  ;;  %p996_p5 = scmp.ge.s32.totalorder %s1369_s21, 1 }
   0xb   : > { %p1448_p6 = por %p157_p3, %p43_p0  ;;  %p164_p7 = scmp.lt.s32.totalorder %s1369_s21, 3 }
   0xc   : > { %s175_s28 = sshll.u32 %s1676_s1, 4  ;;  %s1371_s30 = smov [#allocation5]   ;;  %s176_s28 = int_to_ptr.hbm [resolvable:$true] %s175_s28 }
   0xd   : > { %p1456_p8 = pnand %p996_p5, %p164_p7  ;;  %s177_s6 = sshll.u32 %s1371_s30, 4  ;;  %s178_s6 = int_to_ptr.vmem [resolvable:$true] %s177_s6 }
   0xe   : > { %s190_s10 = sshll.u32 %s1677_s2, 4  ;;  %s1372_s11 = smov 384   ;;  %s191_s10 = int_to_ptr.hbm [resolvable:$true] %s190_s10 }
   0xf   : > { %p1057_p9 = pneg %p1456_p8  ;;  %s1373_s12 = smov 24  }
  0x10   : > { %s1374_s13 = smov [#allocation7]   ;;  %s201_s17 = sshll.u32 %s1678_s3, 4  ;;  %s202_s17 = int_to_ptr.hbm [resolvable:$true] %s201_s17 }
  0x11   : > { %p1464_p10 = pnand %p1057_p9, %p44_p1  ;;  %s192_s14 = sshll.u32 %s1374_s13, 4  ;;  %s193_s14 = int_to_ptr.vmem [resolvable:$true] %s192_s14 }
  0x12   : > { %s1375_s23 = smov [#allocation8]   ;;  %s1681_s27 = smov 128  }
  0x13   : > { %1060 = dma.hbm_to_vmem [thread:$0]  (!%p1464_p10), %s176_s28, 6144, %s178_s6, [#allocation6], %s1372_s11, %s1372_s11, %s1373_s12  }
  0x14   : > { %1063 = dma.hbm_to_vmem [thread:$0]  (!%p1464_p10), %s191_s10, 48, %s193_s14, [#allocation6]  }
  0x15   : > { %s203_s26 = sshll.u32 %s1375_s23, 4  ;;  %s1377_s28 = smov 8   ;;  %s204_s26 = int_to_ptr.vmem [resolvable:$true] %s203_s26 }
  0x16   : > { %1066 = dma.hbm_to_vmem [thread:$0]  (!%p1464_p10), %s202_s17, 2048, %s204_s26, [#allocation9], %s1681_s27, %s1681_s27, %s1377_s28  }
  0x17   : > { %s1485_s30 = sadd.s32 1, %s1369_s21   ;;  %s30_s8 = sadd.s32 1, %s1365_s20 }
  0x18   : > { %s27_s6 = ssub.s32 %s1369_s21, %s1485_s30  ;;  %p37_p13 = scmp.ne.s32.totalorder %s1365_s20, %s1361_s19 }
  0x19   : > { %p28_p12 = scmp.eq.s32.totalorder %s27_s6, 0  ;;  %p38_p0 = scmp.eq.s32.totalorder %s1369_s21, 0 }
  0x1a   : > { %p1498_p3 = por %p151_p2, %p37_p13  ;;  %p1078_p5 = scmp.lt.s32.totalorder %s1369_s21, 2 }
  0x1b   : > { %s1494_s9 = scalar_select %p28_p12, %s1365_s20, %s30_s8  }
  0x1c   : > { %s220_s7 = sand.u32 1, %s1365_s20   ;;  %s1039_s11 = sshll.u32 %s1369_s21, 4 }
  0x1d   : > { %p39_p7 = por %p38_p0, %p37_p13  ;;  %s1001_s12 = sshll.u32 %s220_s7, 4 }
  0x1e   : > { %s229_s15 = scalar_lea.hbm %s1675_s0, %s1039_s11  ;;  %s224_s17 = scalar_lea.vmem [#allocation2], %s1001_s12 }
  0x1f   : > { %s230_s16 = sshll.u32 %s229_s15, 4  ;;  %s232_s23 = sshll.u32 %s224_s17, 4  ;;  %s231_s16 = int_to_ptr.hbm [resolvable:$true] %s230_s16  ;;  %s233_s23 = int_to_ptr.vmem [resolvable:$true] %s232_s23 }
  0x20   : > { %p1508_p9 = pnand %p1078_p5, %p39_p7  ;;  %s221_s6 = scalar_lea.sflag [#allocation3], %s220_s7 }
  0x21   : > { %s1265_s8 = sshra.s32 %s231_s16, 4  ;;  %s1272_s12 = scalar_lea.hbm %s1675_s0, 32  ;;  %s1266_s8 = int_to_ptr.hbm [resolvable:$true] %s1265_s8 }
  0x22   : > { %s1267_s27 = scalar_lea.hbm %s1266_s8, 16  ;;  %p1269_p10 = pneg %p1508_p9 }
  0x23   : > { %p1268_p2 = scmp.ne.s32.totalorder %s1266_s8, %s1267_s27  ;;  %p1273_p0 = scmp.lt.s32.totalorder %s1266_s8, %s1675_s0 }
  0x24   : > { %p1274_p5 = scmp.lt.s32.totalorder %s1272_s12, %s1267_s27 }
  0x25   : > { %p1270_p12 = pnand %p1269_p10, %p1268_p2 }
  0x26   : > { %p1275_p7 = por %p1274_p5, %p1273_p0 }
  0x27   : > { %p1271_p13 = pneg %p1270_p12 }
  0x29   : > { %p1276_p11 = pnand %p1275_p7, %p1271_p13 }
  0x2b   : > { %1279 = shalt.err (!%p1276_p11)
}
  0x2c   : > { %s1688_s7 = smov 128   ;;  %244 = sbr.rel (%p1456_p8) target bundleno = 1441 (0x5a1), region = 40 }
  0x2d   : > { %1070 = dma.hbm_to_vmem [thread:$0]  (!%p1508_p9), %s231_s16, 256, %s233_s23, %s221_s6, %s1688_s7, %s1688_s7, %s1377_s28  }
  0x2e   : > { %s1528_s17 = sand.u32 (!%p1456_p8), 1, %s1361_s19  }
  0x2f   : > { %s1005_s27 = sshll.u32 (!%p1456_p8), %s1528_s17, 4  ;;  %s247_s8 = scalar_lea.sflag (!%p1456_p8), [#allocation3], %s1528_s17 }
  0x30   : > { %s1534_s11 = scalar_lea.vmem (!%p1456_p8), [#allocation2], %s1005_s27 }
  0x31   : > { %1340 = dma.done.wait (%p1443_p4), %s247_s8, 256  }
  0x32   : > { %1342 = vsyncadd (%p1443_p4), %s247_s8, 4294967040 }
  0x33   : > { %1344 = dma.done.wait (%p44_p1), [#allocation6], 6192  }
  0x34   : > { %1346 = vsyncadd (%p44_p1), [#allocation6], 4294961104 }
  0x35   : > { %1348 = dma.done.wait (%p44_p1), [#allocation9], 2048  }
  0x36   : > { %1350 = vsyncadd (%p44_p1), [#allocation9], 4294965248  ;;  %v341_v0 = vld [vmem:[#allocation5 + $0x170] sm:$0xff]  ;;  %v338_v1 = vld [vmem:[#allocation5 + $0x158] sm:$0xff]  ;;  %vm422_vm0 = vcmask 261120   ;;  %s1378_s24 = smov 64  }
  0x37   : > { %374 = vmatpush.msra.mxu1 %v341_v0  ;;  %v335_v2 = vld [vmem:[#allocation5 + $0x140] sm:$0xff]  ;;  %v340_v3 = vld [vmem:[#allocation5 + $0x168] sm:$0xff]  ;;  %v337_v4 = vld [vmem:[#allocation5 + $0x150] sm:$0xff]  ;;  %s1379_s29 = smov 96   ;;  %s1380_s28 = smov 32   ;;  %vm458_vm1 = vcmask 130048  }
  0x38   : > { %351 = vmatpush.msra.mxu0 %v340_v3  ;;  %v332_v5 = vld [vmem:[#allocation5 + $0x128] sm:$0xff]  ;;  %v334_v6 = vld [vmem:[#allocation5 + $0x138] sm:$0xff]  ;;  %v329_v7 = vld [vmem:[#allocation5 + $0x110] sm:$0xff]  ;;  %vm826_vm2 = vcmask 523264   ;;  %vm829_vm3 = vcmask 785408   ;;  %s292_s26 = scalar_lea.vmem [#allocation10], %s1005_s27 }
  0x39   : > { %375 = vmatpush.msra.mxu1 %v338_v1  ;;  %v331_v8 = vld [vmem:[#allocation5 + $0x120] sm:$0xff]  ;;  %v326_v9 = vld [vmem:[#allocation5 + $0xf8] sm:$0xff]  ;;  %v328_v10 = vld [vmem:[#allocation5 + $0x108] sm:$0xff]  ;;  %s1040_s6 = sshll.u32 %s1434_s22, 4  ;;  %s890_s15 = sshll.u32 %s292_s26, 4  ;;  %s891_s15 = int_to_ptr.vmem [resolvable:$true] %s890_s15 }
  0x3a   : > { %352 = vmatpush.msra.mxu0 %v337_v4  ;;  %v323_v11 = vld [vmem:[#allocation5 + $0xe0] sm:$0xff]  ;;  %v325_v12 = vld [vmem:[#allocation5 + $0xf0] sm:$0xff]  ;;  %v342_v13 = vld [vmem:[#allocation5 + $0x178] sm:$0xff]  ;;  %s889_s14 = scalar_lea.hbm %s1680_s5, %s1040_s6  ;;  %s878_s8 = scalar_lea.sflag [#allocation4], %s1528_s17 }
  0x3b   : > { %376 = vmatpush.msra.mxu1 %v335_v2  ;;  %v339_v14 = vld [vmem:[#allocation5 + $0x160] sm:$0xff]  ;;  %v320_v15 = vld [vmem:[#allocation5 + $0xc8] sm:$0xff]  ;;  %v322_v16 = vld [vmem:[#allocation5 + $0xd8] sm:$0xff]  ;;  %397 = vmatpush.msra.mxu2 %v342_v13  ;;  %s892_s7 = sshll.u32 %s889_s14, 4  ;;  %s893_s7 = int_to_ptr.hbm [resolvable:$true] %s892_s7 }
  0x3c   : > { %353 = vmatpush.msra.mxu0 %v334_v6  ;;  %v336_v17 = vld [vmem:[#allocation5 + $0x148] sm:$0xff]  ;;  %v317_v18 = vld [vmem:[#allocation5 + $0xb0] sm:$0xff]  ;;  %v319_v19 = vld [vmem:[#allocation5 + $0xc0] sm:$0xff] }
  0x3d   : > { %377 = vmatpush.msra.mxu1 %v332_v5  ;;  %398 = vmatpush.msra.mxu2 %v339_v14  ;;  %v333_v20 = vld [vmem:[#allocation5 + $0x130] sm:$0xff]  ;;  %v314_v21 = vld [vmem:[#allocation5 + $0x98] sm:$0xff]  ;;  %v316_v22 = vld [vmem:[#allocation5 + $0xa8] sm:$0xff] }
  0x3e   : > { %354 = vmatpush.msra.mxu0 %v331_v8  ;;  %v330_v23 = vld [vmem:[#allocation5 + $0x118] sm:$0xff]  ;;  %v311_v24 = vld [vmem:[#allocation5 + $0x80] sm:$0xff]  ;;  %v313_v25 = vld [vmem:[#allocation5 + $0x90] sm:$0xff] }
  0x3f   : > { %378 = vmatpush.msra.mxu1 %v329_v7  ;;  %399 = vmatpush.msra.mxu2 %v336_v17  ;;  %v327_v26 = vld [vmem:[#allocation5 + $0x100] sm:$0xff]  ;;  %v308_v27 = vld [vmem:[#allocation5 + $0x68] sm:$0xff]  ;;  %v310_v28 = vld [vmem:[#allocation5 + $0x78] sm:$0xff] }
  0x40   : > { %355 = vmatpush.msra.mxu0 %v328_v10  ;;  %v324_v29 = vld [vmem:[#allocation5 + $0xe8] sm:$0xff]  ;;  %v305_v30 = vld [vmem:[#allocation5 + $0x50] sm:$0xff]  ;;  %v307_v31 = vld [vmem:[#allocation5 + $0x60] sm:$0xff] }
  0x41   : > { %379 = vmatpush.msra.mxu1 %v326_v9  ;;  %400 = vmatpush.msra.mxu2 %v333_v20  ;;  %v321_v32 = vld [vmem:[#allocation5 + $0xd0] sm:$0xff]  ;;  %v302_v33 = vld [vmem:[#allocation5 + $0x38] sm:$0xff]  ;;  %v304_v34 = vld [vmem:[#allocation5 + $0x48] sm:$0xff] }
  0x42   : > { %356 = vmatpush.msra.mxu0 %v325_v12  ;;  %v318_v35 = vld [vmem:[#allocation5 + $0xb8] sm:$0xff]  ;;  %v299_v36 = vld [vmem:[#allocation5 + $0x20] sm:$0xff]  ;;  %v301_v37 = vld [vmem:[#allocation5 + $0x30] sm:$0xff] }
  0x43   : > { %380 = vmatpush.msra.mxu1 %v323_v11  ;;  %401 = vmatpush.msra.mxu2 %v330_v23  ;;  %v315_v38 = vld [vmem:[#allocation5 + $0xa0] sm:$0xff]  ;;  %v296_v39 = vld [vmem:[#allocation5 + $0x8] sm:$0xff]  ;;  %v298_v40 = vld [vmem:[#allocation5 + $0x18] sm:$0xff] }
  0x44   : > { %357 = vmatpush.msra.mxu0 %v322_v16  ;;  %v293_v41 = vld [vmem:[%s1534_s11] sm:$0xff]  ;;  %v312_v42 = vld [vmem:[#allocation5 + $0x88] sm:$0xff]  ;;  %v306_v45 = vld [vmem:[#allocation5 + $0x58] sm:$0xff] }
  0x45   : > { %381 = vmatpush.msra.mxu1 %v320_v15  ;;  %402 = vmatpush.msra.mxu2 %v327_v26  ;;  %v295_v43 = vld [vmem:[#allocation5] sm:$0xff]  ;;  %v309_v44 = vld [vmem:[#allocation5 + $0x70] sm:$0xff]  ;;  %v294_v47 = vld [vmem:[%s1534_s11 + $0x8] sm:$0xff]  ;;  %s1309_s11 = sshra.s32 %s893_s7, 4  ;;  %s1310_s11 = int_to_ptr.hbm [resolvable:$true] %s1309_s11 }
  0x46   : > { %358 = vmatpush.msra.mxu0 %v319_v19  ;;  %v303_v46 = vld [vmem:[#allocation5 + $0x40] sm:$0xff]  ;;  %v300_v48 = vld [vmem:[#allocation5 + $0x28] sm:$0xff]  ;;  %v297_v49 = vld [vmem:[#allocation5 + $0x10] sm:$0xff]  ;;  %p1316_p11 = scmp.lt.s32.totalorder %s1310_s11, %s1680_s5 }
  0x47   : > { %382 = vmatpush.msra.mxu1 %v317_v18  ;;  %403 = vmatpush.msra.mxu2 %v324_v29  ;;  %v343_v51 = vld [vmem:[#allocation7] sm:$0x7] }
  0x48   : > { %359 = vmatpush.msra.mxu0 %v316_v22  ;;  %v346_v53 = vperm.slane %v343_v51, 1  ;;  %v345_v54 = vperm.slane %v343_v51, 0  ;;  %v347_v0 = vperm.slane %v343_v51, 2 }
  0x49   : > { %383 = vmatpush.msra.mxu1 %v314_v21  ;;  %404 = vmatpush.msra.mxu2 %v321_v32 }
  0x4a   : > { %360 = vmatpush.msra.mxu0 %v313_v25 }
  0x4b   : > { %384 = vmatpush.msra.mxu1 %v311_v24  ;;  %405 = vmatpush.msra.mxu2 %v318_v35 }
  0x4c   : > { %361 = vmatpush.msra.mxu0 %v310_v28 }
  0x4d   : > { %385 = vmatpush.msra.mxu1 %v308_v27  ;;  %406 = vmatpush.msra.mxu2 %v315_v38 }
  0x4e   : > { %362 = vmatpush.msra.mxu0 %v307_v31 }
  0x4f   : > { %386 = vmatpush.msra.mxu1 %v305_v30  ;;  %407 = vmatpush.msra.mxu2 %v312_v42 }
  0x50   : > { %363 = vmatpush.msra.mxu0 %v304_v34 }
  0x51   : > { %387 = vmatpush.msra.mxu1 %v302_v33  ;;  %408 = vmatpush.msra.mxu2 %v309_v44 }
  0x52   : > { %364 = vmatpush.msra.mxu0 %v301_v37 }
  0x53   : > { %388 = vmatpush.msra.mxu1 %v299_v36  ;;  %409 = vmatpush.msra.mxu2 %v306_v45 }
  0x54   : > { %365 = vmatpush.msra.mxu0 %v298_v40 }
  0x55   : > { %389 = vmatpush.msra.mxu1 %v296_v39  ;;  %410 = vmatpush.msra.mxu2 %v303_v46 }
  0x56   : > { %390 = vmatmul.f32.vlgmr.msra.gmra.mxu1 %v293_v41  ;;  %366 = vmatpush.msra.mxu0 %v295_v43 }
  0x57   : > { %367 = vmatmul.f32.vlgmr.msra.gmra.mxu0 %v293_v41  ;;  %411 = vmatpush.msra.mxu2 %v300_v48 }
  0x59   : > { %412 = vmatpush.msra.mxu2 %v297_v49 }
  0x5a   : > { %413 = vmatmul.f32.vlgmr.msra.gmra.mxu2 %v293_v41 }
  0x5e   : > { %393 = vmatmul.f32.gmra.mxu1 %v294_v47 }
  0x5f   : > { %370 = vmatmul.f32.gmra.mxu0 %v294_v47 }
  0x62   : > { %416 = vmatmul.f32.gmra.mxu2 %v294_v47 }
  0xd3   : > { %v391_v50 = vpop.f32.mrf.mxu1 }
  0xd4   : > { %v368_v52 = vpop.f32.mrf.mxu0  ;;  %v392_v58 = vadd.f32 %v391_v50, %v346_v53 }
  0xd5   : > { %v369_v57 = vadd.f32 %v368_v52, %v345_v54 }
  0xd7   : > { %v1553_v59 = vmul.f32 0.17677669, %v369_v57 }
  0xdb   : > { %v394_v55 = vpop.f32.mrf.mxu1 }
  0xdc   : > { %v395_v56 = vadd.f32 %v394_v55, %v346_v53  ;;  %v371_v60 = vpop.f32.mrf.mxu0 }
  0xdd   : > { %v372_v61 = vadd.f32 %v371_v60, %v345_v54  ;;  %v414_v63 = vpop.f32.mrf.mxu2 }
  0xde   : > { %614 = vrot.lane.b32.xlu1 %v395_v56, %s1378_s24  ;;  %516 = vrot.lane.b32.xlu2 %v395_v56, %s1379_s29  ;;  %v1562_v2 = vadd.f32 %v414_v63, %v347_v0 }
  0xdf   : > { %1010 = vmatpush.xpose.msk.msra.mxu3 %vm422_vm0, %v395_v56  ;;  %v421_v62 = vmul.f32 0.17677669, %v372_v61 }
  0xe3   : > { %1011 = vmatpush.xpose.msk.msra.mxu3 %vm422_vm0, %v392_v58 }
  0xe5   : > { %v417_v1 = vpop.f32.mrf.mxu2 }
  0xe6   : > { %1012 = vmatmul.msk.f32.vlgmr.msra.gmra.mxu3 %vm422_vm0, %v1553_v59  ;;  %514 = vrot.lane.b32.xlu2 %v392_v58, %s1379_s29  ;;  %v1564_v3 = vadd.f32 %v417_v1, %v347_v0 }
  0xe8   : > { %501 = vmatpush.msrb.mxu3 %v1564_v3  ;;  %v1127_v55 = vpack.i.bf16 %v1562_v2, %v1564_v3 }
  0xea   : > { %502 = vmatpush.msrb.mxu3 %v1562_v2 }
  0xee   : > { %1013 = vmatmul.msk.f32.gmra.mxu3 %vm422_vm0, %v421_v62  ;;  %612 = vrot.lane.b32.xlu2 %v392_v58, %s1378_s24 }
  0xf6   : > { %512 = vrot.lane.b32.xlu2 %v421_v62, %s1379_s29 }
  0xfe   : > { %608 = vrot.lane.b32.xlu2 %v1553_v59, %s1378_s24 }
 0x106   : > { %708 = vrot.lane.b32.xlu2 %v392_v58, %s1380_s28 }
 0x10e   : > { %706 = vrot.lane.b32.xlu2 %v421_v62, %s1380_s28 }
 0x138   : > { %v517_v4 = vpop.permute.xlu2 %516 }
 0x139   : > { %1016 = vmatpush.xpose.msk.msra.mxu3 %vm422_vm0, %v517_v4 }
 0x140   : > { %v515_v5 = vpop.permute.xlu2 %514 }
 0x141   : > { %1017 = vmatpush.xpose.msk.msra.mxu3 %vm422_vm0, %v515_v5 }
 0x148   : > { %v613_v6 = vpop.permute.xlu2 %612 }
 0x150   : > { %v615_v7 = vpop.permute.xlu1 %614  ;;  %v513_v8 = vpop.permute.xlu2 %512 }
 0x151   : > { %1022 = vmatpush.xpose.msk.msrb.mxu2 %vm422_vm0, %v615_v7 }
 0x155   : > { %1023 = vmatpush.xpose.msk.msrb.mxu2 %vm422_vm0, %v613_v6 }
 0x158   : > { %v609_v9 = vpop.permute.xlu2 %608 }
 0x159   : > { %1024 = vmatmul.msk.f32.vlgmr.msrb.gmra.mxu2 %vm422_vm0, %v609_v9 }
 0x160   : > { %v709_v33 = vpop.permute.xlu2 %708 }
 0x168   : > { %v707_v39 = vpop.permute.xlu2 %706 }
 0x169   : > { %v452_v10 = vpop.f32.mrf.mxu3 }
 0x16a   : > { %v459_v11 = vsel %vm458_vm1, %v452_v10, -inf }
 0x16b   : > { %460 = vmax.xlane.f32.xlu0 %v459_v11 }
 0x171   : > { %v455_v12 = vpop.f32.mrf.mxu3 }
 0x172   : > { %v462_v13 = vsel %vm458_vm1, %v455_v12, -inf }
 0x173   : > { %463 = vmax.xlane.f32.xlu0 %v462_v13 }
 0x187   : > { %510 = vrot.lane.b32.xlu0 %v1553_v59, %s1379_s29 }
 0x18f   : > { %710 = vrot.lane.b32.xlu0 %v395_v56, %s1380_s28 }
 0x197   : > { %610 = vrot.lane.b32.xlu0 %v421_v62, %s1378_s24 }
 0x1dc   : > { %v641_v14 = vpop.f32.mrf.mxu2 }
 0x1dd   : > { %v647_v15 = vsel %vm458_vm1, %v641_v14, -inf }
 0x1de   : > { %v461_v16 = vpop.xlane.xlu0 %460  ;;  %648 = vmax.xlane.f32.xlu2 %v647_v15 }
 0x1df   : > { %v465_v17 = vsub.f32 %v452_v10, %v461_v16 }
 0x1e1   : > { %v467_v18 = vmul.f32 1.442695, %v465_v17 }
 0x1e3   : > { %1143 = vpow2.f32 %v467_v18 }
 0x1e6   : > { %v464_v19 = vpop.xlane.xlu0 %463 }
 0x1e7   : > { %v466_v20 = vsub.f32 %v455_v12, %v464_v19 }
 0x1e9   : > { %v1144_v21 = vpop.eup %1143  ;;  %v469_v22 = vmul.f32 1.442695, %v466_v20 }
 0x1ea   : > { %v471_v23 = vsel %vm458_vm1, %v1144_v21, 0.0 }
 0x1eb   : > { %1145 = vpow2.f32 %v469_v22  ;;  %472 = vadd.xlane.f32.xlu1 %v471_v23 }
 0x1f1   : > { %v1146_v24 = vpop.eup %1145 }
 0x1f2   : > { %v474_v25 = vsel %vm458_vm1, %v1146_v24, 0.0 }
 0x1f3   : > { %475 = vadd.xlane.f32.xlu1 %v474_v25 }
 0x1f9   : > { %v511_v26 = vpop.permute.xlu0 %510 }
 0x201   : > { %v711_v27 = vpop.permute.xlu0 %710 }
 0x209   : > { %v611_v28 = vpop.permute.xlu0 %610 }
 0x20a   : > { %1025 = vmatmul.msk.f32.gmra.mxu2 %vm422_vm0, %v611_v28 }
 0x20c   : > { %704 = vrot.lane.b32.xlu1 %v1553_v59, %s1380_s28 }
 0x251   : > { %v649_v44 = vpop.xlane.xlu2 %648 }
 0x252   : > { %v653_v45 = vsub.f32 %v641_v14, %v649_v44 }
 0x254   : > { %v655_v48 = vmul.f32 1.442695, %v653_v45 }
 0x25e   : > { %v473_v29 = vpop.xlane.xlu1 %472 }
 0x25f   : > { %1147 = vrcp.f32 %v473_v29 }
 0x265   : > { %v1148_v30 = vpop.eup %1147 }
 0x266   : > { %v476_v31 = vpop.xlane.xlu1 %475  ;;  %v479_v32 = vmul.f32 %v1148_v30, %v1144_v21 }
 0x267   : > { %1149 = vrcp.f32 %v476_v31 }
 0x268   : > { %1014 = vmatmul.msk.f32.vlgmr.msrb.gmra.mxu3 %vm458_vm1, %v479_v32  ;;  %1151 = vpow2.f32 %v655_v48 }
 0x269   : > { %1028 = vmatpush.xpose.msk.msrb.mxu3 %vm422_vm0, %v711_v27 }
 0x26d   : > { %v1150_v34 = vpop.eup %1149  ;;  %1029 = vmatpush.xpose.msk.msrb.mxu3 %vm422_vm0, %v709_v33 }
 0x26e   : > { %v480_v35 = vmul.f32 %v1150_v34, %v1146_v24  ;;  %v1605_v51 = vpop.eup %1151 }
 0x26f   : > { %v659_v53 = vsel %vm458_vm1, %v1605_v51, 0.0 }
 0x270   : > { %1015 = vmatmul.msk.f32.gmra.mxu3 %vm458_vm1, %v480_v35 }
 0x278   : > { %1018 = vmatmul.msk.f32.vlgmr.msra.gmra.mxu3 %vm422_vm0, %v511_v26 }
 0x27e   : > { %v705_v36 = vpop.permute.xlu1 %704 }
 0x280   : > { %1019 = vmatmul.msk.f32.gmra.mxu3 %vm422_vm0, %v513_v8 }
 0x288   : > { %1030 = vmatmul.msk.f32.vlgmr.msrb.gmra.mxu3 %vm422_vm0, %v705_v36 }
 0x28d   : > { %v644_v37 = vpop.f32.mrf.mxu2 }
 0x28e   : > { %v650_v38 = vsel %vm458_vm1, %v644_v37, -inf }
 0x28f   : > { %651 = vmax.xlane.f32.xlu0 %v650_v38 }
 0x290   : > { %1031 = vmatmul.msk.f32.gmra.mxu3 %vm422_vm0, %v707_v39 }
 0x2eb   : > { %v1598_v40 = vpop.f32.mrf.mxu3 }
 0x2f3   : > { %v1600_v41 = vpop.f32.mrf.mxu3 }
 0x2fb   : > { %v543_v42 = vpop.f32.mrf.mxu3 }
 0x2fc   : > { %v549_v43 = vsel %vm458_vm1, %v543_v42, -inf }
 0x2fd   : > { %550 = vmax.xlane.f32.xlu1 %v549_v43 }
 0x302   : > { %v652_v56 = vpop.xlane.xlu0 %651 }
 0x303   : > { %v546_v46 = vpop.f32.mrf.mxu3  ;;  %v654_v57 = vsub.f32 %v644_v37, %v652_v56  ;;  %v842_v56 = vld [vmem:[#allocation8 + $0x50] sm:$0xff] }
 0x304   : > { %v552_v47 = vsel %vm458_vm1, %v546_v46, -inf }
 0x305   : > { %553 = vmax.xlane.f32.xlu0 %v552_v47  ;;  %v657_v58 = vmul.f32 1.442695, %v654_v57 }
 0x307   : > { %1153 = vpow2.f32 %v657_v58  ;;  %v841_v58 = vld [vmem:[#allocation8 + $0x48] sm:$0xff] }
 0x30b   : > { %v737_v49 = vpop.f32.mrf.mxu3 }
 0x30c   : > { %v743_v50 = vsel %vm458_vm1, %v737_v49, -inf }
 0x30d   : > { %744 = vmax.xlane.f32.xlu1 %v743_v50  ;;  %v1154_v59 = vpop.eup %1153 }
 0x30e   : > { %v662_v60 = vsel %vm458_vm1, %v1154_v59, 0.0 }
 0x313   : > { %v740_v52 = vpop.f32.mrf.mxu3 }
 0x314   : > { %v746_v54 = vsel %vm458_vm1, %v740_v52, -inf }
 0x315   : > { %660 = vadd.xlane.f32.xlu1 %v659_v53  ;;  %747 = vmax.xlane.f32.xlu2 %v746_v54  ;;  %v845_v53 = vld [vmem:[#allocation8 + $0x68] sm:$0xff]  ;;  %v844_v54 = vld [vmem:[#allocation8 + $0x60] sm:$0xff] }
 0x319   : > { %1128 = vrot.lane.b32.xlu0 %v1127_v55, %s1379_s29 }
 0x343   : > { %663 = vadd.xlane.f32.xlu0 %v662_v60  ;;  %v839_v60 = vld [vmem:[#allocation8 + $0x38] sm:$0xff] }
 0x370   : > { %v551_v61 = vpop.xlane.xlu1 %550 }
 0x371   : > { %v555_v62 = vsub.f32 %v543_v42, %v551_v61  ;;  %v838_v61 = vld [vmem:[#allocation8 + $0x30] sm:$0xff] }
 0x373   : > { %v557_v63 = vmul.f32 1.442695, %v555_v62  ;;  %v837_v62 = vld [vmem:[#allocation8 + $0x28] sm:$0xff] }
 0x375   : > { %1155 = vpow2.f32 %v557_v63  ;;  %v836_v63 = vld [vmem:[#allocation8 + $0x20] sm:$0xff] }
 0x378   : > { %v554_v0 = vpop.xlane.xlu0 %553 }
 0x379   : > { %v556_v1 = vsub.f32 %v546_v46, %v554_v0  ;;  %v835_v0 = vld [vmem:[#allocation8 + $0x18] sm:$0xff] }
 0x37b   : > { %v1156_v4 = vpop.eup %1155  ;;  %v559_v5 = vmul.f32 1.442695, %v556_v1  ;;  %v834_v1 = vld [vmem:[#allocation8 + $0x10] sm:$0xff] }
 0x37c   : > { %v561_v2 = vsel %vm458_vm1, %v1156_v4, 0.0 }
 0x37d   : > { %1157 = vpow2.f32 %v559_v5  ;;  %562 = vadd.xlane.f32.xlu1 %v561_v2  ;;  %v832_v5 = vld [vmem:[#allocation8] sm:$0xff] }
 0x380   : > { %v745_v3 = vpop.xlane.xlu1 %744 }
 0x381   : > { %v749_v6 = vsub.f32 %v737_v49, %v745_v3 }
 0x383   : > { %v1158_v7 = vpop.eup %1157  ;;  %v751_v8 = vmul.f32 1.442695, %v749_v6 }
 0x384   : > { %v564_v9 = vsel %vm458_vm1, %v1158_v7, 0.0 }
 0x385   : > { %1159 = vpow2.f32 %v751_v8  ;;  %565 = vadd.xlane.f32.xlu2 %v564_v9 }
 0x388   : > { %v748_v15 = vpop.xlane.xlu2 %747  ;;  %v661_v20 = vpop.xlane.xlu1 %660 }
 0x389   : > { %v750_v16 = vsub.f32 %v740_v52, %v748_v15  ;;  %v846_v52 = vld [vmem:[#allocation8 + $0x70] sm:$0xff] }
 0x38b   : > { %v1160_v10 = vpop.eup %1159  ;;  %v1129_v11 = vpop.permute.xlu0 %1128  ;;  %v753_v17 = vmul.f32 1.442695, %v750_v16 }
 0x38c   : > { %v755_v12 = vsel %vm458_vm1, %v1160_v10, 0.0  ;;  %v1130_v13 = vunpack.i.l.bf16 %v1129_v11  ;;  %v1131_v14 = vunpack.i.h.bf16 %v1129_v11 }
 0x38d   : > { %756 = vadd.xlane.f32.xlu1 %v755_v12  ;;  %1161 = vpow2.f32 %v753_v17 }
 0x38e   : > { %599 = vmatpush.msrb.mxu0 %v1130_v13 }
 0x390   : > { %600 = vmatpush.msrb.mxu0 %v1131_v14 }
 0x393   : > { %v1162_v18 = vpop.eup %1161 }
 0x394   : > { %v758_v19 = vsel %vm458_vm1, %v1162_v18, 0.0 }
 0x39d   : > { %1133 = vrot.lane.b32.xlu2 %v1127_v55, %s1378_s24 }
 0x3a6   : > { %1138 = vrot.lane.b32.xlu1 %v1127_v55, %s1380_s28  ;;  %v843_v55 = vld [vmem:[#allocation8 + $0x58] sm:$0xff] }
 0x3b6   : > { %v664_v26 = vpop.xlane.xlu0 %663 }
 0x3c6   : > { %759 = vadd.xlane.f32.xlu2 %v758_v19 }
 0x3f0   : > { %v563_v21 = vpop.xlane.xlu1 %562 }
 0x3f1   : > { %1163 = vrcp.f32 %v563_v21 }
 0x3f7   : > { %v1164_v22 = vpop.eup %1163 }
 0x3f8   : > { %v566_v23 = vpop.xlane.xlu2 %565  ;;  %v569_v24 = vmul.f32 %v1164_v22, %v1156_v4  ;;  %v833_v4 = vld [vmem:[#allocation8 + $0x8] sm:$0xff] }
 0x3f9   : > { %1165 = vrcp.f32 %v566_v23 }
 0x3fa   : > { %1020 = vmatmul.msk.f32.vlgmr.msrb.gmra.mxu0 %vm458_vm1, %v569_v24  ;;  %1167 = vrcp.f32 %v661_v20 }
 0x3fb   : > { %1169 = vrcp.f32 %v664_v26 }
 0x3ff   : > { %v1166_v25 = vpop.eup %1165 }
 0x400   : > { %v1134_v27 = vpop.permute.xlu2 %1133  ;;  %v570_v28 = vmul.f32 %v1166_v25, %v1158_v7  ;;  %v1168_v29 = vpop.eup %1167 }
 0x401   : > { %v1135_v30 = vunpack.i.l.bf16 %v1134_v27  ;;  %v1136_v31 = vunpack.i.h.bf16 %v1134_v27  ;;  %v667_v32 = vmul.f32 %v1168_v29, %v1605_v51  ;;  %v1170_v33 = vpop.eup %1169  ;;  %v757_v35 = vpop.xlane.xlu1 %756  ;;  %v847_v51 = vld [vmem:[#allocation8 + $0x78] sm:$0xff] }
 0x402   : > { %1021 = vmatmul.msk.f32.gmra.mxu0 %vm458_vm1, %v570_v28  ;;  %v668_v34 = vmul.f32 %v1170_v33, %v1154_v59  ;;  %1171 = vrcp.f32 %v757_v35  ;;  %852 = vmatpush.msrb.mxu1 %v847_v51  ;;  %v840_v59 = vld [vmem:[#allocation8 + $0x40] sm:$0xff] }
 0x403   : > { %695 = vmatpush.msra.mxu2 %v1135_v30 }
 0x404   : > { %853 = vmatpush.msrb.mxu1 %v846_v52 }
 0x405   : > { %696 = vmatpush.msra.mxu2 %v1136_v31 }
 0x406   : > { %1026 = vmatmul.msk.f32.vlgmr.msra.gmra.mxu2 %vm458_vm1, %v667_v32  ;;  %854 = vmatpush.msrb.mxu1 %v845_v53 }
 0x408   : > { %v1172_v37 = vpop.eup %1171  ;;  %855 = vmatpush.msrb.mxu1 %v844_v54 }
 0x409   : > { %v763_v42 = vmul.f32 %v1172_v37, %v1160_v10 }
 0x40a   : > { %856 = vmatpush.msrb.mxu1 %v843_v55 }
 0x40c   : > { %857 = vmatpush.msrb.mxu1 %v842_v56 }
 0x40e   : > { %1027 = vmatmul.msk.f32.gmra.mxu2 %vm458_vm1, %v668_v34  ;;  %858 = vmatpush.msrb.mxu1 %v841_v58 }
 0x410   : > { %859 = vmatpush.msrb.mxu1 %v840_v59 }
 0x412   : > { %860 = vmatpush.msrb.mxu1 %v839_v60 }
 0x414   : > { %861 = vmatpush.msrb.mxu1 %v838_v61 }
 0x416   : > { %862 = vmatpush.msrb.mxu1 %v837_v62 }
 0x418   : > { %v1139_v36 = vpop.permute.xlu1 %1138  ;;  %863 = vmatpush.msrb.mxu1 %v836_v63 }
 0x419   : > { %v1140_v38 = vunpack.i.l.bf16 %v1139_v36  ;;  %v1141_v39 = vunpack.i.h.bf16 %v1139_v36 }
 0x41a   : > { %864 = vmatpush.msrb.mxu1 %v835_v0 }
 0x41b   : > { %791 = vmatpush.msra.mxu0 %v1140_v38 }
 0x41c   : > { %865 = vmatpush.msrb.mxu1 %v834_v1 }
 0x41d   : > { %792 = vmatpush.msra.mxu0 %v1141_v39 }
 0x41e   : > { %1032 = vmatmul.msk.f32.vlgmr.msra.gmra.mxu0 %vm458_vm1, %v763_v42  ;;  %866 = vmatpush.msrb.mxu1 %v833_v4 }
 0x420   : > { %867 = vmatpush.msrb.mxu1 %v832_v5 }
 0x439   : > { %v760_v43 = vpop.xlane.xlu2 %759 }
 0x43a   : > { %1173 = vrcp.f32 %v760_v43 }
 0x440   : > { %v1174_v44 = vpop.eup %1173 }
 0x441   : > { %v764_v45 = vmul.f32 %v1174_v44, %v1162_v18 }
 0x443   : > { %1033 = vmatmul.msk.f32.gmra.mxu0 %vm458_vm1, %v764_v45 }
 0x477   : > { %v602_v46 = vpop.f32.mrf.mxu0 }
 0x47f   : > { %v605_v48 = vpop.f32.mrf.mxu0 }
 0x489   : > { %v698_v47 = vpop.f32.mrf.mxu2 }
 0x48a   : > { %810 = vrot.lane.b32.xlu1 %v698_v47, %s1378_s24 }
 0x491   : > { %v701_v50 = vpop.f32.mrf.mxu2 }
 0x492   : > { %802 = vrot.lane.b32.xlu1 %v602_v46, %s1380_s28 }
 0x49a   : > { %804 = vrot.lane.b32.xlu1 %v605_v48, %s1380_s28 }
 0x49b   : > { %v794_v49 = vpop.f32.mrf.mxu0 }
 0x49c   : > { %818 = vrot.lane.b32.xlu0 %v794_v49, %s1379_s29 }
 0x4a2   : > { %812 = vrot.lane.b32.xlu1 %v701_v50, %s1378_s24  ;;  %s1311_s24 = scalar_lea.hbm %s1310_s11, 16 }
 0x4a3   : > { %p1312_p1 = scmp.ne.s32.totalorder %s1310_s11, %s1311_s24 }
 0x4a5   : > { %p1313_p4 = pnand %p1312_p1, %p1498_p3 }
 0x4a7   : > { %p1314_p8 = pneg %p1313_p4 }
 0x4c0   : > { %v797_v57 = vpop.f32.mrf.mxu0 }
 0x4c1   : > { %820 = vrot.lane.b32.xlu2 %v797_v57, %s1379_s29  ;;  %s1315_s29 = scalar_lea.hbm %s1680_s5, 32 }
 0x4c2   : > { %p1317_p9 = scmp.lt.s32.totalorder %s1315_s29, %s1311_s24 }
 0x4c4   : > { %p1318_p2 = por %p1317_p9, %p1316_p11 }
 0x4c6   : > { %p1319_p10 = pnand %p1318_p2, %p1314_p8 }
 0x4fc   : > { %v811_v2 = vpop.permute.xlu1 %810 }
 0x504   : > { %v803_v3 = vpop.permute.xlu1 %802 }
 0x505   : > { %v824_v6 = vsel %vm422_vm0, %v1598_v40, %v803_v3  ;;  %v1142_v40 = vld [vmem:[%s1679_s4] ss:$0 sm:$0xff] }
 0x506   : > { %v827_v9 = vsel %vm826_vm2, %v824_v6, %v811_v2 }
 0x50c   : > { %v805_v7 = vpop.permute.xlu1 %804 }
 0x50d   : > { %v825_v12 = vsel %vm422_vm0, %v1600_v41, %v805_v7 }
 0x50e   : > { %v819_v8 = vpop.permute.xlu0 %818 }
 0x50f   : > { %v830_v10 = vsel %vm829_vm3, %v827_v9, %v819_v8 }
 0x510   : > { %868 = vmatmul.f32.vlgmr.msrb.gmra.mxu1 %v830_v10 }
 0x514   : > { %v813_v11 = vpop.permute.xlu1 %812 }
 0x515   : > { %v828_v13 = vsel %vm826_vm2, %v825_v12, %v813_v11 }
 0x51b   : > { %v821_v14 = vpop.permute.xlu2 %820 }
 0x51c   : > { %v831_v15 = vsel %vm829_vm3, %v828_v13, %v821_v14 }
 0x51d   : > { %871 = vmatmul.f32.gmra.mxu1 %v831_v15 }
 0x58d   : > { %v869_v16 = vpop.f32.mrf.mxu1 }
 0x58e   : > { %v870_v17 = vadd.f32 %v1142_v40, %v869_v16 }
 0x590   : > { %875 = vst [vmem:[%s292_s26] sm:$0xff] %v870_v17 }
 0x59a   : > { %v872_v41 = vpop.f32.mrf.mxu1 }
 0x59b   : > { %v873_v18 = vadd.f32 %v1142_v40, %v872_v41 }
 0x59d   : > { %876 = vst [vmem:[%s292_s26 + $0x8] sm:$0xff] %v873_v18 }
 0x59e   : > { %1322 = shalt.err (!%p1319_p10)
}
 0x59f   : > { %s1381_s17 = smov 128   ;;  %s1382_s23 = smov 8  }
 0x5a0   : > { %1055 = dma.vmem_to_hbm [thread:$0]  (%p1498_p3), %s891_s15, 256, %s893_s7, %s878_s8, %s1381_s17, %s1381_s17, %s1382_s23  }
 0x5a1 PF: > { %s907_s26 = sand.u32 1, %s1357_s18   ;;  %p1689_p12 = scmp.ge.s32.totalorder %s1369_s21, 2 }
 0x5a2   : > { %s908_s6 = scalar_lea.sflag [#allocation4], %s907_s26 }
 0x5a3   : > { %p1072_p13 = pnand %p1689_p12, %p1448_p6 }
 0x5a5   : > { %p1073_p0 = pneg %p1072_p13 }
 0x5a7   : > { %1352 = dma.done.wait (%p1073_p0), %s908_s6, 256  }
 0x5a8   : > { %1354 = vsyncadd (%p1073_p0), %s908_s6, 4294967040  ;;  %p20_p5 = scmp.ge.s32.totalorder %s1485_s30, 4   ;;  %s1690_s18 = smov %s1361_s19 }
 0x5a9   : > { %s1691_s19 = smov %s1365_s20  ;;  %s1692_s20 = smov %s1494_s9 }
 0x5aa   : > { %s1693_s21 = smov %s1485_s30  ;;  %22 = sbr.rel (!%p20_p5) target bundleno = 7 (0x7), region = 97 }
 0x5af   :  { %914 = vsyncpa [#allocation3], 1 }
 0x5b0   :  { %916 = vsyncpa [#allocation3 + $0x1], 1 }
 0x5b1   :  { %917 = vsyncpa [#allocation6], 1 }
 0x5b2   :  { %918 = vsyncpa [#allocation9], 1 }
 0x5b3   :  { %919 = vsyncpa [#allocation4], 1 }
 0x5b4   :  { %921 = vsyncpa [#allocation4 + $0x1], 1 }

</bundles_post_ra>
